<compile_context>
chip_gen: v6e
topology: v6e:2x2x1
jax: 0.10.0
libtpu: 0.0.40
codegen_flags: <defaults>
</compile_context>

<pallas_src>
import functools

import jax
import jax.numpy as jnp
from jax import lax
from jax.experimental import pallas as pl
from jax.experimental.pallas import tpu as pltpu

LANES = 128
MAX_BLOCK_ROWS = 4096  # 4096 * 128 * 4 B = 2 MiB per f32 input tile per step


def _round_up(x, m):
    return ((x + m - 1) // m) * m


def _sublane_align(dtype):
    # Minimum sublane multiple for a packed dtype: 8 (f32), 16 (bf16/f16), 32 (8-bit).
    return 8 * max(1, 4 // jnp.dtype(dtype).itemsize)


def _focal_loss_kernel(x_ref, t_ref, o_ref, *, alpha, eps, par, steps,
                       block_rows, valid_rows_last):
    p = pl.program_id(0)
    i = pl.program_id(1)

    @pl.when(i == 0)
    def _init():
        o_ref[...] = jnp.zeros_like(o_ref)

    # Upcast per-tile (free VPU work hidden under the DMA); clamp + BCE loss.
    x = jnp.clip(x_ref[...].astype(jnp.float32), eps, 1.0 - eps)
    t = t_ref[...].astype(jnp.float32)
    loss = -(alpha * t * jnp.log(x) + (1.0 - t) * jnp.log(1.0 - x))

    def slab_sum(v):
        # (block_rows, 128) -> (8, 128): sum the 8-row sublane slabs (VPU adds only).
        if block_rows == 8:
            return v
        return v.reshape(block_rows // 8, 8, LANES).sum(axis=0)

    if valid_rows_last < block_rows:  # static: a ragged final block exists
        is_last = jnp.logical_and(p == par - 1, i == steps - 1)

        @pl.when(jnp.logical_not(is_last))
        def _full():
            o_ref[...] += slab_sum(loss)

        @pl.when(is_last)
        def _ragged():
            # Only the globally-last block is ragged; rows >= valid_rows_last
            # hold unspecified (DMA-untouched) data and are zeroed exactly.
            row = lax.broadcasted_iota(jnp.int32, loss.shape, 0)
            o_ref[...] += slab_sum(jnp.where(row < valid_rows_last, loss, 0.0))
    else:
        o_ref[...] += slab_sum(loss)


def _elem_loss(x, t, alpha, eps):
    x = jnp.clip(x.astype(jnp.float32), eps, 1.0 - eps)
    t = t.astype(jnp.float32)
    return -(alpha * t * jnp.log(x) + (1.0 - t) * jnp.log(1.0 - x))


def focal_loss(inputs, target, alpha=3.0, eps=1e-7, size_average=True):
    """Pallas TPU implementation of focalloss.forward."""
    assert inputs.shape == target.shape
    n = int(inputs.size)
    alpha = float(alpha)
    eps = float(eps)

    x = inputs.reshape(-1)
    t = target.reshape(-1)
    # Stream native dtype when floating (bf16/f16/f32); otherwise upcast once.
    if not jnp.issubdtype(x.dtype, jnp.floating):
        x = x.astype(jnp.float32)
    if not jnp.issubdtype(t.dtype, jnp.floating):
        t = t.astype(jnp.float32)

    rows = n // LANES
    total = jnp.zeros((), jnp.float32)

    if rows > 0:
        align = max(_sublane_align(x.dtype), _sublane_align(t.dtype))

        # Static tiling: prefer a 2-way "parallel" split (v7x dual-TC) whenever
        # there are at least two aligned sublane slabs of rows, while
        # guaranteeing no grid block is ever fully out of bounds.
        par = 1
        if rows >= 2 * align:
            steps2 = pl.cdiv(rows, 2 * MAX_BLOCK_ROWS)
            br2 = _round_up(pl.cdiv(rows, 2 * steps2), align)
            if (2 * steps2 - 1) * br2 < rows:
                par, steps, block_rows = 2, steps2, br2
        if par == 1:
            block_rows = min(MAX_BLOCK_ROWS, _round_up(rows, align))
            steps = pl.cdiv(rows, block_rows)

        nb = par * steps
        valid_rows_last = rows - (nb - 1) * block_rows  # in (0, block_rows]

        n_main = rows * LANES
        # Aligned case: pure reshape (bitcast, no HBM copy). Ragged case: prefix
        # slice of the lane-aligned portion (tail handled with jnp below).
        x2 = (x if n_main == n else x[:n_main]).reshape(rows, LANES)
        t2 = (t if n_main == n else t[:n_main]).reshape(rows, LANES)

        in_spec = pl.BlockSpec((block_rows, LANES),
                               lambda p, i: (p * steps + i, 0))
        out_spec = pl.BlockSpec((8, LANES), lambda p, i: (p, 0))

        partials = pl.pallas_call(
            functools.partial(_focal_loss_kernel, alpha=alpha, eps=eps,
                              par=par, steps=steps, block_rows=block_rows,
                              valid_rows_last=valid_rows_last),
            out_shape=jax.ShapeDtypeStruct((par * 8, LANES), jnp.float32),
            grid_spec=pltpu.PrefetchScalarGridSpec(
                num_scalar_prefetch=0,
                grid=(par, steps),
                in_specs=[in_spec, in_spec],
                out_specs=out_spec,
            ),
            compiler_params=pltpu.CompilerParams(
                dimension_semantics=("parallel", "arbitrary"),
                vmem_limit_bytes=48 * 1024 * 1024),
        )(x2, t2)

        total = total + jnp.sum(partials, dtype=jnp.float32)

    tail = n - rows * LANES
    if tail:  # < 128 elements: trivial plain-jnp path
        total = total + jnp.sum(
            _elem_loss(x[rows * LANES:], t[rows * LANES:], alpha, eps),
            dtype=jnp.float32)

    if size_average:
        return total / jnp.float32(n)
    return total


def _reference(inputs, target, alpha=3.0, eps=1e-7, size_average=True):
    x = jnp.clip(inputs.astype(jnp.float32), eps, 1.0 - eps)
    t = target.astype(jnp.float32)
    loss = -(alpha * t * jnp.log(x) + (1.0 - t) * jnp.log(1.0 - x))
    return loss.mean() if size_average else loss.sum()


if __name__ == "__main__":
    key = jax.random.PRNGKey(0)
    k1, k2, k3, k4, k5, k6 = jax.random.split(key, 6)

    # NCHW probability map + binary targets (128-aligned element count:
    # zero-copy path, par=2, unmasked).
    x = jax.random.uniform(k1, (2, 4, 16, 16), dtype=jnp.float32)
    t = (jax.random.uniform(k2, (2, 4, 16, 16)) > 0.5).astype(jnp.float32)
    out = jax.block_until_ready(focal_loss(x, t, alpha=3.0, eps=1e-7,
                                           size_average=True))
    ref = _reference(x, t, alpha=3.0, eps=1e-7, size_average=True)
    assert jnp.allclose(out, ref, rtol=1e-5, atol=1e-6), (out, ref)

    # Ragged size (not a multiple of 128): single-shard masked last block +
    # jnp lane tail.
    xr = jax.random.uniform(k3, (3, 5, 7, 11), dtype=jnp.float32)
    tr = (jax.random.uniform(k4, (3, 5, 7, 11)) > 0.5).astype(jnp.float32)
    out_r = jax.block_until_ready(focal_loss(xr, tr, size_average=False))
    ref_r = _reference(xr, tr, size_average=False)
    assert jnp.allclose(out_r, ref_r, rtol=2e-5, atol=1e-3), (out_r, ref_r)

    # Ragged + par=2: exercises the last-block gating under the parallel split.
    xs = jax.random.uniform(k5, (1, 3, 37, 29), dtype=jnp.float32)
    ts = (jax.random.uniform(k6, (1, 3, 37, 29)) > 0.5).astype(jnp.float32)
    out_s = jax.block_until_ready(focal_loss(xs, ts, size_average=True))
    ref_s = _reference(xs, ts, size_average=True)
    assert jnp.allclose(out_s, ref_s, rtol=2e-5, atol=1e-5), (out_s, ref_s)

    print("KERNEL_OK")
</pallas_src>

<mosaic_0001>
module attributes {stable_mosaic.version = 11 : i64} {
  func.func @_focal_loss_kernel(%arg0: i32, %arg1: i32, %arg2: memref<8x128xf32, #tpu.memory_space<vmem>>, %arg3: memref<8x128xf32, #tpu.memory_space<vmem>>, %arg4: memref<8x128xf32, #tpu.memory_space<vmem>>) attributes {dimension_semantics = [#tpu.dimension_semantics<parallel>, #tpu.dimension_semantics<arbitrary>], iteration_bounds = array<i64: 2, 1>, scalar_prefetch = 0 : i64, scratch_operands = 0 : i64, tpu.core_type = #tpu.core_type<tc>, window_params = [{transform_indices = @transform_0, window_bounds = array<i64: 8, 128>}, {transform_indices = @transform_1, window_bounds = array<i64: 8, 128>}, {transform_indices = @transform_2, window_bounds = array<i64: 8, 128>}]} {
    %c0_i32 = arith.constant 0 : i32
    %0 = arith.cmpi eq, %arg1, %c0_i32 : i32
    %1 = arith.extui %0 : i1 to i32
    %c0_i32_0 = arith.constant 0 : i32
    %2 = arith.cmpi ne, %1, %c0_i32_0 : i32
    scf.if %2 {
      %cst_13 = arith.constant 0.000000e+00 : f32
      %25 = vector.broadcast %cst_13 : f32 to vector<8x128xf32>
      %c0_14 = arith.constant 0 : index
      %c0_15 = arith.constant 0 : index
      %26 = vector.load %arg4[%c0_14, %c0_15] : memref<8x128xf32, #tpu.memory_space<vmem>>, vector<8x128xf32>
      tpu.vector_store %arg4[%c0_14, %c0_15], %25 {strides = array<i32>} : memref<8x128xf32, #tpu.memory_space<vmem>>, vector<8x128xf32>,
    } else {
    }
    %c0 = arith.constant 0 : index
    %c0_1 = arith.constant 0 : index
    %3 = vector.load %arg2[%c0, %c0_1] : memref<8x128xf32, #tpu.memory_space<vmem>>, vector<8x128xf32>
    %cst = arith.constant 1.000000e-07 : f32
    %cst_2 = arith.constant 0.99999988 : f32
    %4 = vector.broadcast %cst : f32 to vector<8x128xf32>
    %5 = arith.maximumf %4, %3 : vector<8x128xf32>
    %6 = vector.broadcast %cst_2 : f32 to vector<8x128xf32>
    %7 = arith.minimumf %6, %5 : vector<8x128xf32>
    %c0_3 = arith.constant 0 : index
    %c0_4 = arith.constant 0 : index
    %8 = vector.load %arg3[%c0_3, %c0_4] : memref<8x128xf32, #tpu.memory_space<vmem>>, vector<8x128xf32>
    %cst_5 = arith.constant 3.000000e+00 : f32
    %9 = vector.broadcast %cst_5 : f32 to vector<8x128xf32>
    %10 = arith.mulf %9, %8 : vector<8x128xf32>
    %11 = math.log %7 : vector<8x128xf32>
    %12 = arith.mulf %10, %11 : vector<8x128xf32>
    %cst_6 = arith.constant 1.000000e+00 : f32
    %13 = vector.broadcast %cst_6 : f32 to vector<8x128xf32>
    %14 = arith.subf %13, %8 : vector<8x128xf32>
    %cst_7 = arith.constant 1.000000e+00 : f32
    %15 = vector.broadcast %cst_7 : f32 to vector<8x128xf32>
    %16 = arith.subf %15, %7 : vector<8x128xf32>
    %17 = math.log %16 : vector<8x128xf32>
    %18 = arith.mulf %14, %17 : vector<8x128xf32>
    %19 = arith.addf %12, %18 : vector<8x128xf32>
    %cst_8 = arith.constant 0.000000e+00 : f32
    %20 = vector.broadcast %cst_8 : f32 to vector<8x128xf32>
    %21 = arith.subf %20, %19 : vector<8x128xf32>
    %c0_9 = arith.constant 0 : index
    %c0_10 = arith.constant 0 : index
    %22 = vector.load %arg4[%c0_9, %c0_10] : memref<8x128xf32, #tpu.memory_space<vmem>>, vector<8x128xf32>
    %23 = arith.addf %22, %21 : vector<8x128xf32>
    %c0_11 = arith.constant 0 : index
    %c0_12 = arith.constant 0 : index
    %24 = vector.load %arg4[%c0_11, %c0_12] : memref<8x128xf32, #tpu.memory_space<vmem>>, vector<8x128xf32>
    tpu.vector_store %arg4[%c0_11, %c0_12], %23 {strides = array<i32>} : memref<8x128xf32, #tpu.memory_space<vmem>>, vector<8x128xf32>,
    return
  }
  func.func @transform_0(%arg0: i32, %arg1: i32) -> (i32, i32) {
    %c1_i32 = arith.constant 1 : i32
    %0 = arith.muli %arg0, %c1_i32 : i32
    %1 = arith.addi %0, %arg1 : i32
    %c0_i32 = arith.constant 0 : i32
    %c0_i32_0 = arith.constant 0 : i32
    return %1, %c0_i32 : i32, i32
  }
  func.func @transform_1(%arg0: i32, %arg1: i32) -> (i32, i32) {
    %c1_i32 = arith.constant 1 : i32
    %0 = arith.muli %arg0, %c1_i32 : i32
    %1 = arith.addi %0, %arg1 : i32
    %c0_i32 = arith.constant 0 : i32
    %c0_i32_0 = arith.constant 0 : i32
    return %1, %c0_i32 : i32, i32
  }
  func.func @transform_2(%arg0: i32, %arg1: i32) -> (i32, i32) {
    %c0_i32 = arith.constant 0 : i32
    %c0_i32_0 = arith.constant 0 : i32
    return %arg0, %c0_i32 : i32, i32
  }
}

</mosaic_0001>

<bundles_post_ra>
// kernel: tpu_custom_call.1
= control target key start
LH: loop header
LB: loop body
LE: loop exit
PB: predicated region body
PF: predicated region fallthrough
CT: control target
= control target key end

     0   :  { %7 = vsyncpa [#allocation3], 0  ;;  %s770_s0 = inlined_call_operand.hbm [shape: f32[16,128], index: 0, kind: input, shape index: {}]   ;;  %s771_s1 = inlined_call_operand.hbm [shape: f32[16,128], index: 1, kind: input, shape index: {}]   ;;  %s772_s2 = inlined_call_operand.hbm [shape: f32[16,128], index: 2, kind: output, shape index: {}]  }
   0x1   :  { %9 = vsyncpa [#allocation3 + $0x1], 0 }
   0x2   :  { %10 = vsyncpa [#allocation6], 0 }
   0x3   :  { %12 = vsyncpa [#allocation6 + $0x1], 0 }
   0x4   :  { %13 = vsyncpa [#allocation4], 0 }
   0x5   :  { %15 = vsyncpa [#allocation4 + $0x1], 0  ;;  %s604_s9 = smov 0   ;;  %s606_s10 = smov 0  }
   0x6   :  { %s608_s11 = smov 0   ;;  %s610_s12 = smov 0  }
   0x7   :  { %s612_s13 = smov 0   ;;  %s614_s14 = smov 0  }
   0x8 LB: > { %s356_s15 = sadd.s32 4294967295, %s584_s14   ;;  %s357_s16 = sadd.s32 4294967294, %s584_s14   ;;  %s584_s14 = sphi %s614_s14, %s21_s14   ;;  %s580_s13 = sphi %s612_s13, %s784_s13   ;;  %s576_s12 = sphi %s610_s12, %s783_s12   ;;  %s572_s11 = sphi %s608_s11, %s782_s11   ;;  %s568_s10 = sphi %s606_s10, %s781_s10   ;;  %s564_s9 = sphi %s604_s9, %s780_s9  }
   0x9   : > { %s33_s17 = sadd.s32 1, %s580_s13  ;;  %s42_s18 = sadd.s32 1, %s572_s11 }
   0xa   : > { %p35_p0 = scmp.ge.s32.totalorder %s33_s17, 2  ;;  %p49_p1 = scmp.ne.s32.totalorder %s572_s11, %s568_s10 }
   0xb   : > { %p50_p2 = scmp.eq.s32.totalorder %s584_s14, 0  ;;  %p55_p3 = scmp.ne.s32.totalorder %s568_s10, %s564_s9 }
   0xc   : > { %s786_s17 = smov (%p35_p0, %s33_s17), 0  ;;  %p56_p5 = scmp.eq.s32.totalorder %s356_s15, 0 }
   0xd   : > { %p645_p4 = por %p50_p2, %p49_p1  ;;  %s39_s20 = ssub.s32 %s580_s13, %s786_s17 }
   0xe   : > { %p107_p6 = scmp.eq.s32.totalorder %s356_s15, 1  ;;  %p40_p7 = scmp.eq.s32.totalorder %s39_s20, 0 }
   0xf   : > { %p651_p8 = por %p56_p5, %p55_p3  ;;  %p113_p10 = scmp.eq.s32.totalorder %s357_s16, 1 }
  0x10   : > { %p655_p9 = por %p107_p6, %p49_p1  ;;  %p389_p13 = scmp.lt.s32.totalorder %s584_s14, 2 }
  0x11   : > { %s660_s23 = scalar_select %p40_p7, %s572_s11, %s42_s18  }
  0x12   : > { %p662_p11 = por %p113_p10, %p55_p3  ;;  %s669_s25 = sand.u32 1, %s572_s11  }
  0x13   : > { %s360_s26 = sshll.u32 %s669_s25, 3  ;;  %s361_s27 = sshll.u32 %s580_s13, 7 }
  0x14   : > { %s143_s30 = scalar_lea.hbm %s770_s0, %s361_s27  ;;  %s137_s3 = scalar_lea.vmem [#allocation2], %s360_s26 }
  0x15   : > { %s145_s4 = sshll.u32 %s137_s3, 4  ;;  %p678_p0 = pnand %p389_p13, %p645_p4  ;;  %s146_s4 = int_to_ptr.vmem [resolvable:$true] %s145_s4 }
  0x16   : > { %p364_p1 = scmp.ge.s32.totalorder %s584_s14, 1  ;;  %p169_p2 = scmp.lt.s32.totalorder %s584_s14, 3 }
  0x17   : > { %s134_s6 = scalar_lea.sflag [#allocation3], %s669_s25  ;;  %p446_p3 = pneg %p678_p0 }
  0x18   : > { %s457_s7 = scalar_lea.vmem %s146_s4, 128  ;;  %s586_s8 = smov [#allocation2]  }
  0x19   : > { %p458_p5 = scmp.ne.s32.totalorder %s146_s4, %s457_s7  ;;  %s462_s15 = sshll.u32 %s586_s8, 4  ;;  %s463_s15 = int_to_ptr.vmem [resolvable:$false] %s462_s15 }
  0x1a   : > { %s464_s16 = scalar_lea.vmem %s463_s15, 256  ;;  %p465_p4 = scmp.lt.s32.totalorder %s146_s4, %s463_s15 }
  0x1b   : > { %p460_p6 = pnand %p458_p5, %p446_p3  ;;  %p466_p10 = scmp.lt.s32.totalorder %s464_s16, %s457_s7 }
  0x1d   : > { %p461_p7 = pneg %p460_p6  ;;  %p467_p13 = por %p466_p10, %p465_p4 }
  0x1f   : > { %p468_p12 = pnand %p467_p13, %p461_p7 }
  0x21   : > { %471 = shalt.err (!%p468_p12)
}
  0x22   : > { %381 = dma.hbm_to_vmem [thread:$0]  (!%p678_p0), %s143_s30, 128, %s146_s4, %s134_s6  }
  0x23   : > { %p696_p5 = pnand %p364_p1, %p169_p2  ;;  %s162_s28 = scalar_lea.hbm %s771_s1, %s361_s27 }
  0x24   : > { %s156_s29 = scalar_lea.vmem [#allocation5], %s360_s26  ;;  %s153_s7 = scalar_lea.sflag [#allocation6], %s669_s25 }
  0x25   : > { %s164_s3 = sshll.u32 %s156_s29, 4  ;;  %s587_s30 = smov [#allocation5]   ;;  %s165_s3 = int_to_ptr.vmem [resolvable:$true] %s164_s3 }
  0x26   : > { %s485_s8 = scalar_lea.vmem %s165_s3, 128  ;;  %s490_s4 = sshll.u32 %s587_s30, 4  ;;  %s491_s4 = int_to_ptr.vmem [resolvable:$false] %s490_s4 }
  0x27   : > { %p486_p12 = scmp.ne.s32.totalorder %s165_s3, %s485_s8  ;;  %s492_s6 = scalar_lea.vmem %s491_s4, 256 }
  0x28   : > { %p493_p1 = scmp.lt.s32.totalorder %s165_s3, %s491_s4  ;;  %p494_p2 = scmp.lt.s32.totalorder %s492_s6, %s485_s8 }
  0x29   : > { %p488_p6 = pnand %p486_p12, %p446_p3 }
  0x2a   : > { %p495_p4 = por %p494_p2, %p493_p1 }
  0x2b   : > { %p489_p7 = pneg %p488_p6 }
  0x2d   : > { %p496_p10 = pnand %p495_p4, %p489_p7 }
  0x2f   : > { %499 = shalt.err (!%p496_p10)
}
  0x30   : > { %384 = dma.hbm_to_vmem [thread:$0]  (!%p678_p0), %s162_s28, 128, %s165_s3, %s153_s7  }
  0x31   : > { %173 = sbr.rel (%p696_p5) target bundleno = 99 (0x63), region = 28  ;;  %s712_s25 = sand.u32 (!%p696_p5), 1, %s568_s10  }
  0x32   : > { %s715_s26 = sshll.u32 (!%p696_p5), %s712_s25, 3  ;;  %s176_s27 = scalar_lea.sflag (!%p696_p5), [#allocation3], %s712_s25 }
  0x33   : > { %s179_s15 = scalar_lea.vmem (!%p696_p5), [#allocation2], %s715_s26 }
  0x36   : > { %551 = dma.done.wait (%p651_p8), %s176_s27, 128  }
  0x37   : > { %553 = vsyncadd (%p651_p8), %s176_s27, 4294967168  ;;  %s185_s5 = scalar_lea.sflag [#allocation6], %s712_s25  ;;  %s188_s16 = scalar_lea.vmem [#allocation5], %s715_s26 }
  0x38   : > { %555 = dma.done.wait (%p651_p8), %s185_s5, 128  }
  0x39   : > { %557 = vsyncadd (%p651_p8), %s185_s5, 4294967168  ;;  %v221_v0 = vld [vmem:[%s179_s15] sm:$0xff]  ;;  %v224_v4 = vld [vmem:[%s188_s16] sm:$0xff]  ;;  %s369_s21 = sshll.u32 %s576_s12, 7  ;;  %s213_s18 = scalar_lea.vmem [#allocation7], %s715_s26 }
  0x3a   : > { %v222_v1 = vmax.f32 %v221_v0, 1e-07  ;;  %v225_v5 = vmul.f32 3.0, %v224_v4  ;;  %v229_v8 = vsub.f32 1.0, %v224_v4  ;;  %s253_s19 = sshll.u32 %s213_s18, 4  ;;  %s251_s29 = scalar_lea.hbm %s772_s2, %s369_s21  ;;  %s254_s19 = int_to_ptr.vmem [resolvable:$true] %s253_s19 }
  0x3b   : > { %s240_s3 = scalar_lea.sflag [#allocation4], %s712_s25  ;;  %s500_s7 = scalar_lea.vmem %s254_s19, 128 }
  0x3c   : > { %v223_v2 = vmin.f32 %v222_v1, 0.9999999  ;;  %p501_p8 = scmp.ne.s32.totalorder %s254_s19, %s500_s7  ;;  %s588_s8 = smov [#allocation7]  }
  0x3d   : > { %s504_s30 = sshll.u32 %s588_s8, 4  ;;  %s505_s30 = int_to_ptr.vmem [resolvable:$false] %s504_s30 }
  0x3e   : > { %440 = vlog2.f32 %v223_v2  ;;  %v230_v3 = vsub.f32 1.0, %v223_v2  ;;  %p502_p0 = pnand %p501_p8, %p655_p9  ;;  %s506_s4 = scalar_lea.vmem %s505_s30, 256 }
  0x3f   : > { %p507_p13 = scmp.lt.s32.totalorder %s254_s19, %s505_s30  ;;  %p508_p5 = scmp.lt.s32.totalorder %s506_s4, %s500_s7 }
  0x40   : > { %442 = vlog2.f32 %v230_v3  ;;  %p503_p3 = pneg %p502_p0 }
  0x41   : > { %p509_p12 = por %p508_p5, %p507_p13 }
  0x43   : > { %p510_p6 = pnand %p509_p12, %p503_p3 }
  0x4b   : > { %v441_v6 = vpop.eup %440 }
  0x4c   : > { %v227_v7 = vmul.f32 0.6931472, %v441_v6 }
  0x4d   : > { %v443_v9 = vpop.eup %442 }
  0x4e   : > { %v228_v10 = vmul.f32 %v227_v7, %v225_v5  ;;  %v232_v11 = vmul.f32 0.6931472, %v443_v9 }
  0x50   : > { %v233_v12 = vmul.f32 %v232_v11, %v229_v8 }
  0x52   : > { %v234_v13 = vadd.f32 %v233_v12, %v228_v10 }
  0x54   : > { %v235_v14 = vsub.f32 0.0, %v234_v13 }
  0x56   : > { %238 = vst [vmem:[%s213_s18] sm:$0xff] %v235_v14 }
  0x57   : > { %513 = shalt.err (!%p510_p6)
}
  0x58   : > { %s514_s12 = scalar_lea.hbm %s251_s29, 128  ;;  %s518_s26 = scalar_lea.hbm %s772_s2, 256 }
  0x59   : > { %p515_p7 = scmp.ne.s32.totalorder %s251_s29, %s514_s12  ;;  %p519_p4 = scmp.lt.s32.totalorder %s251_s29, %s772_s2 }
  0x5a   : > { %p520_p10 = scmp.lt.s32.totalorder %s518_s26, %s514_s12 }
  0x5b   : > { %p516_p1 = pnand %p515_p7, %p655_p9 }
  0x5c   : > { %p521_p8 = por %p520_p10, %p519_p4 }
  0x5d   : > { %p517_p2 = pneg %p516_p1 }
  0x5f   : > { %p522_p0 = pnand %p521_p8, %p517_p2 }
  0x61   : > { %525 = shalt.err (!%p522_p0)
}
  0x62   : > { %376 = dma.vmem_to_hbm [thread:$0]  (%p655_p9), %s254_s19, 128, %s251_s29, %s240_s3  }
  0x63 PF: > { %s265_s5 = sand.u32 1, %s564_s9   ;;  %p779_p3 = scmp.ge.s32.totalorder %s584_s14, 2 }
  0x64   : > { %s266_s16 = scalar_lea.sflag [#allocation4], %s265_s5 }
  0x65   : > { %p386_p13 = pnand %p779_p3, %p662_p11 }
  0x67   : > { %p387_p5 = pneg %p386_p13 }
  0x69   : > { %559 = dma.done.wait (%p387_p5), %s266_s16, 128  }
  0x6a   : > { %561 = vsyncadd (%p387_p5), %s266_s16, 4294967168  ;;  %s21_s14 = sadd.s32 1, %s584_s14   ;;  %s780_s9 = smov %s568_s10 }
  0x6b   : > { %p18_p12 = scmp.ge.s32.totalorder %s21_s14, 4   ;;  %s781_s10 = smov %s572_s11 }
  0x6c   : > { %s782_s11 = smov %s660_s23  ;;  %s783_s12 = smov %s580_s13 }
  0x6d   : > { %s784_s13 = smov %s786_s17  ;;  %20 = sbr.rel (!%p18_p12) target bundleno = 8 (0x8), region = 90 }
  0x72   :  { %271 = vsyncpa [#allocation3], 1 }
  0x73   :  { %273 = vsyncpa [#allocation3 + $0x1], 1 }
  0x74   :  { %274 = vsyncpa [#allocation6], 1 }
  0x75   :  { %276 = vsyncpa [#allocation6 + $0x1], 1 }
  0x76   :  { %277 = vsyncpa [#allocation4], 1 }
  0x77   :  { %279 = vsyncpa [#allocation4 + $0x1], 1 }

</bundles_post_ra>
